<compile_context>
chip_gen: v6e
topology: v6e:2x2x1
jax: 0.10.0
libtpu: 0.0.40
codegen_flags: <defaults>
</compile_context>

<pallas_src>
import math

import jax
import jax.numpy as jnp
from jax import lax
from jax.experimental import pallas as pl
from jax.experimental.pallas import tpu as pltpu

# ----------------------------- problem sizes --------------------------------
B = 2          # batch
N = 8          # num_tokens (sequence length)
D = 32         # embed_dim (hidden_size)
H_TOK = 32     # token_hid_dim
H_EMB = 32     # embedding_hid_dim
L = 2          # num_layers
LN_EPS = 1e-5  # PyTorch nn.LayerNorm default

# row indices inside the packed "vec" parameter array (lane width = D = H_EMB = 32)
_R_G1 = 0            # token-mix LN gamma,   rows [0,   L)
_R_BE1 = L           # token-mix LN beta,    rows [L,  2L)
_R_G2 = 2 * L        # embed-mix LN gamma,   rows [2L, 3L)
_R_BE2 = 3 * L       # embed-mix LN beta,    rows [3L, 4L)
_R_B1E = 4 * L       # embed FF lin1 bias,   rows [4L, 5L)
_R_B2E = 5 * L       # embed FF lin2 bias,   rows [5L, 6L)
_R_GF = 6 * L        # final LN gamma
_R_BF = 6 * L + 1    # final LN beta
_VEC_ROWS = 6 * L + 2


def _gelu_exact(x):
    # PyTorch nn.GELU() default = exact erf-based GELU (erf -> EUP slot, ~free).
    return 0.5 * x * (1.0 + lax.erf(x * (1.0 / math.sqrt(2.0))))


def _layer_norm(x, gamma, beta):
    mu = jnp.mean(x, axis=-1, keepdims=True)
    var = jnp.mean((x - mu) ** 2, axis=-1, keepdims=True)
    return (x - mu) * lax.rsqrt(var + LN_EPS) * gamma + beta


# ------------------------------- the kernel ---------------------------------
def nlpmixer_kernel(mask_ref, x_ref,
                    vec_ref,         # (6L+2, D)  packed LN params + embed-FF biases
                    tokbias_ref,     # (L, B*H_TOK + B*N, D) pre-broadcast token-FF biases
                    w1t_ref,         # (L, B*H_TOK, B*N)  block-diag token FF lin1
                    w2t_ref,         # (L, B*N, B*H_TOK)  block-diag token FF lin2
                    w1e_ref,         # (L, D, H_EMB)      embed FF lin1
                    w2e_ref,         # (L, H_EMB, D)      embed FF lin2
                    o_ref):
    x = x_ref[...]            # (B*N, D) -- all batches stacked along sublanes
    mask = mask_ref[...]      # (B*N, D) -- pre-broadcast in the wrapper

    def row(i):               # one (1, D) parameter row from the packed array
        return vec_ref[pl.ds(i, 1), :]

    for l in range(L):        # static unrolled loop over mixer blocks
        # x = x * attention_mask
        x = x * mask

        # ---- token mixing branch (block-diag weights, no relayout) ----
        xln = _layer_norm(x, row(_R_G1 + l), row(_R_BE1 + l))             # (B*N, D)
        h = jnp.dot(w1t_ref[l], xln, preferred_element_type=jnp.float32)  # (B*H_TOK, D)
        h = _gelu_exact(h + tokbias_ref[l, :B * H_TOK, :])
        tok = jnp.dot(w2t_ref[l], h, preferred_element_type=jnp.float32)  # (B*N, D)
        tok = tok + tokbias_ref[l, B * H_TOK:, :]
        x = x + tok

        # ---- embedding (channel) mixing branch ----
        xln2 = _layer_norm(x, row(_R_G2 + l), row(_R_BE2 + l))            # (B*N, D)
        h2 = jnp.dot(xln2, w1e_ref[l], preferred_element_type=jnp.float32)  # (B*N, H_EMB)
        h2 = _gelu_exact(h2 + row(_R_B1E + l))
        emb = jnp.dot(h2, w2e_ref[l], preferred_element_type=jnp.float32)   # (B*N, D)
        emb = emb + row(_R_B2E + l)
        x = x + emb

    # final LayerNorm
    x = _layer_norm(x, row(_R_GF), row(_R_BF))
    o_ref[...] = x.astype(o_ref.dtype)   # single coalesced (B*N, D) store


# ------------------------------- wrapper -------------------------------------
def nlpmixer_forward(attention_mask, x, params):
    """attention_mask: (B, N) float32; x: (B, N, D) float32 -> (B, N, D)."""
    (g1, be1, w1t, b1t, w2t, b2t, g2, be2, w1e, b1e, w2e, b2e, gf, bf) = params

    # Layout plumbing done wrapper-side (pure broadcast/replication of constants):
    mask_full = jnp.broadcast_to(
        attention_mask.astype(jnp.float32)[:, :, None], (B, N, D)).reshape(B * N, D)
    x_rows = x.reshape(B * N, D)

    # packed (rows, 32) small-vector parameters
    vec = jnp.concatenate(
        [g1, be1, g2, be2, b1e, b2e, gf[None, :], bf[None, :]], axis=0)
    assert vec.shape == (_VEC_ROWS, D)

    # block-diagonal replication of the batch-shared token-mix weights
    eye = jnp.eye(B, dtype=jnp.float32)
    w1t_blk = jnp.einsum('bc,lpq->lbpcq', eye, w1t).reshape(L, B * H_TOK, B * N)
    w2t_blk = jnp.einsum('bc,lpq->lbpcq', eye, w2t).reshape(L, B * N, B * H_TOK)

    # token-FF biases: tile over batch (rows) and pre-broadcast to lane width D
    b1t_blk = jnp.broadcast_to(jnp.tile(b1t, (1, B))[:, :, None], (L, B * H_TOK, D))
    b2t_blk = jnp.broadcast_to(jnp.tile(b2t, (1, B))[:, :, None], (L, B * N, D))
    tokbias = jnp.concatenate([b1t_blk, b2t_blk], axis=1)      # (L, B*H_TOK + B*N, D)

    vmem = pl.BlockSpec(memory_space=pltpu.MemorySpace.VMEM)
    kernel_inputs = (mask_full, x_rows, vec, tokbias, w1t_blk, w2t_blk, w1e, w2e)

    out_rows = pl.pallas_call(
        nlpmixer_kernel,
        out_shape=jax.ShapeDtypeStruct((B * N, D), jnp.float32),
        in_specs=[vmem] * len(kernel_inputs),
        out_specs=vmem,
    )(*kernel_inputs)

    return out_rows.reshape(B, N, D)


# --------------------------- pure-JAX reference -------------------------------
def nlpmixer_reference(attention_mask, x, params):
    (g1, be1, w1t, b1t, w2t, b2t, g2, be2, w1e, b1e, w2e, b2e, gf, bf) = params
    mask3 = attention_mask.astype(jnp.float32)[..., None]      # (B, N, 1)
    for l in range(L):
        x = x * mask3
        # token mix: rearrange b n d -> b d n, Linear(N->H_TOK), GELU, Linear(H_TOK->N), back
        xln = _layer_norm(x, g1[l], be1[l])
        xt = jnp.swapaxes(xln, 1, 2)                            # (B, D, N)
        h = _gelu_exact(jnp.einsum('bdn,hn->bdh', xt, w1t[l]) + b1t[l])
        tok = jnp.einsum('bdh,nh->bdn', h, w2t[l]) + b2t[l]
        x = x + jnp.swapaxes(tok, 1, 2)
        # embedding mix
        xln2 = _layer_norm(x, g2[l], be2[l])
        h2 = _gelu_exact(jnp.einsum('bnd,dh->bnh', xln2, w1e[l]) + b1e[l])
        emb = jnp.einsum('bnh,hd->bnd', h2, w2e[l]) + b2e[l]
        x = x + emb
    return _layer_norm(x, gf, bf)


# ------------------------------ param init ------------------------------------
def make_params(key):
    ks = jax.random.split(key, 8)
    scale = 0.05
    g1 = jnp.ones((L, D), jnp.float32)
    be1 = jnp.zeros((L, D), jnp.float32)
    # PyTorch Linear(N, H_TOK).weight has shape (H_TOK, N) -> used directly as w1t.
    w1t = scale * jax.random.normal(ks[0], (L, H_TOK, N), jnp.float32)
    b1t = scale * jax.random.normal(ks[1], (L, H_TOK), jnp.float32)
    # Linear(H_TOK, N).weight has shape (N, H_TOK) -> used directly as w2t.
    w2t = scale * jax.random.normal(ks[2], (L, N, H_TOK), jnp.float32)
    b2t = scale * jax.random.normal(ks[3], (L, N), jnp.float32)
    g2 = jnp.ones((L, D), jnp.float32)
    be2 = jnp.zeros((L, D), jnp.float32)
    # Linear(D, H_EMB).weight is (H_EMB, D); store pre-transposed (D, H_EMB).
    w1e = scale * jax.random.normal(ks[4], (L, D, H_EMB), jnp.float32)
    b1e = scale * jax.random.normal(ks[5], (L, H_EMB), jnp.float32)
    # Linear(H_EMB, D).weight is (D, H_EMB); store pre-transposed (H_EMB, D).
    w2e = scale * jax.random.normal(ks[6], (L, H_EMB, D), jnp.float32)
    b2e = scale * jax.random.normal(ks[7], (L, D), jnp.float32)
    gf = jnp.ones((D,), jnp.float32)
    bf = jnp.zeros((D,), jnp.float32)
    return (g1, be1, w1t, b1t, w2t, b2t, g2, be2, w1e, b1e, w2e, b2e, gf, bf)


if __name__ == "__main__":
    key = jax.random.PRNGKey(0)
    k_x, k_p = jax.random.split(key)

    # input: last_hidden_state (do_embed=False path; BERT embeddings not loaded)
    # TODO(synk): BertModel.from_pretrained embedding lookup / BertOnlyMLMHead have no
    # in-kernel equivalent here; we feed precomputed hidden states (do_embed=False,
    # do_mlm=False path).
    x = jax.random.normal(k_x, (B, N, D), jnp.float32)
    # attention mask with some padded positions zeroed out
    attention_mask = jnp.concatenate(
        [jnp.ones((B, N - 2), jnp.float32), jnp.zeros((B, 2), jnp.float32)], axis=1
    )

    params = make_params(k_p)

    out = nlpmixer_forward(attention_mask, x, params)
    out = jax.block_until_ready(out)

    ref = nlpmixer_reference(attention_mask, x, params)
    assert out.shape == (B, N, D)
    assert jnp.allclose(out, ref, atol=2e-4, rtol=2e-4), "mismatch vs reference"

    print("KERNEL_OK")
</pallas_src>

<mosaic_0001>
module attributes {stable_mosaic.version = 11 : i64} {
  func.func @nlpmixer_kernel(%arg0: memref<16x32xf32, #tpu.memory_space<vmem>>, %arg1: memref<16x32xf32, #tpu.memory_space<vmem>>, %arg2: memref<14x32xf32, #tpu.memory_space<vmem>>, %arg3: memref<2x80x32xf32, #tpu.memory_space<vmem>>, %arg4: memref<2x64x16xf32, #tpu.memory_space<vmem>>, %arg5: memref<2x16x64xf32, #tpu.memory_space<vmem>>, %arg6: memref<2x32x32xf32, #tpu.memory_space<vmem>>, %arg7: memref<2x32x32xf32, #tpu.memory_space<vmem>>, %arg8: memref<16x32xf32, #tpu.memory_space<vmem>>) attributes {dimension_semantics = [], scalar_prefetch = 0 : i64, scratch_operands = 0 : i64, tpu.core_type = #tpu.core_type<tc>} {
    %c0 = arith.constant 0 : index
    %c0_0 = arith.constant 0 : index
    %0 = vector.load %arg1[%c0, %c0_0] : memref<16x32xf32, #tpu.memory_space<vmem>>, vector<16x32xf32>
    %c0_1 = arith.constant 0 : index
    %c0_2 = arith.constant 0 : index
    %1 = vector.load %arg0[%c0_1, %c0_2] : memref<16x32xf32, #tpu.memory_space<vmem>>, vector<16x32xf32>
    %2 = arith.mulf %0, %1 : vector<16x32xf32>
    %c0_3 = arith.constant 0 : index
    %c0_4 = arith.constant 0 : index
    %3 = vector.load %arg2[%c0_3, %c0_4] : memref<14x32xf32, #tpu.memory_space<vmem>>, vector<1x32xf32>
    %c2 = arith.constant 2 : index
    %c0_5 = arith.constant 0 : index
    %4 = vector.load %arg2[%c2, %c0_5] : memref<14x32xf32, #tpu.memory_space<vmem>>, vector<1x32xf32>
    %cst = arith.constant dense<0.000000e+00> : vector<16xf32>
    %5 = vector.multi_reduction <add>, %2, %cst [1] : vector<16x32xf32> to vector<16xf32>
    %6 = vector.shape_cast %5 : vector<16xf32> to vector<16x1xf32>
    %cst_6 = arith.constant 3.200000e+01 : f32
    %7 = vector.broadcast %cst_6 : f32 to vector<16x1xf32>
    %8 = arith.divf %6, %7 : vector<16x1xf32>
    %9 = vector.broadcast %8 : vector<16x1xf32> to vector<16x32xf32>
    %10 = arith.subf %2, %9 : vector<16x32xf32>
    %11 = arith.mulf %10, %10 : vector<16x32xf32>
    %cst_7 = arith.constant dense<0.000000e+00> : vector<16xf32>
    %12 = vector.multi_reduction <add>, %11, %cst_7 [1] : vector<16x32xf32> to vector<16xf32>
    %13 = vector.shape_cast %12 : vector<16xf32> to vector<16x1xf32>
    %cst_8 = arith.constant 3.200000e+01 : f32
    %14 = vector.broadcast %cst_8 : f32 to vector<16x1xf32>
    %15 = arith.divf %13, %14 : vector<16x1xf32>
    %16 = vector.broadcast %8 : vector<16x1xf32> to vector<16x32xf32>
    %17 = arith.subf %2, %16 : vector<16x32xf32>
    %cst_9 = arith.constant 9.99999974E-6 : f32
    %18 = vector.broadcast %cst_9 : f32 to vector<16x1xf32>
    %19 = arith.addf %15, %18 : vector<16x1xf32>
    %20 = math.rsqrt %19 : vector<16x1xf32>
    %21 = vector.broadcast %20 : vector<16x1xf32> to vector<16x32xf32>
    %22 = arith.mulf %17, %21 : vector<16x32xf32>
    %23 = vector.broadcast %3 : vector<1x32xf32> to vector<16x32xf32>
    %24 = arith.mulf %22, %23 : vector<16x32xf32>
    %25 = vector.broadcast %4 : vector<1x32xf32> to vector<16x32xf32>
    %26 = arith.addf %24, %25 : vector<16x32xf32>
    %c0_10 = arith.constant 0 : index
    %c0_11 = arith.constant 0 : index
    %c0_12 = arith.constant 0 : index
    %27 = vector.load %arg4[%c0_10, %c0_11, %c0_12] : memref<2x64x16xf32, #tpu.memory_space<vmem>>, vector<1x64x16xf32>
    %28 = vector.shape_cast %27 : vector<1x64x16xf32> to vector<64x16xf32>
    %cst_13 = arith.constant dense<0.000000e+00> : vector<64x32xf32>
    %29 = tpu.matmul %28, %26, %cst_13 {dimension_numbers = #tpu.dot_dimension_numbers<[1], [0], [0], [1], [0, 0, 1, 1], [], []>} : vector<64x16xf32>, vector<16x32xf32>, vector<64x32xf32> -> vector<64x32xf32>
    %c0_14 = arith.constant 0 : index
    %c0_15 = arith.constant 0 : index
    %c0_16 = arith.constant 0 : index
    %30 = vector.load %arg3[%c0_14, %c0_15, %c0_16] : memref<2x80x32xf32, #tpu.memory_space<vmem>>, vector<1x64x32xf32>
    %31 = vector.shape_cast %30 : vector<1x64x32xf32> to vector<64x32xf32>
    %32 = arith.addf %29, %31 : vector<64x32xf32>
    %cst_17 = arith.constant 5.000000e-01 : f32
    %33 = vector.broadcast %cst_17 : f32 to vector<64x32xf32>
    %34 = arith.mulf %33, %32 : vector<64x32xf32>
    %cst_18 = arith.constant 0.707106769 : f32
    %35 = vector.broadcast %cst_18 : f32 to vector<64x32xf32>
    %36 = arith.mulf %32, %35 : vector<64x32xf32>
    %37 = math.erf %36 : vector<64x32xf32>
    %cst_19 = arith.constant 1.000000e+00 : f32
    %38 = vector.broadcast %cst_19 : f32 to vector<64x32xf32>
    %39 = arith.addf %38, %37 : vector<64x32xf32>
    %40 = arith.mulf %34, %39 : vector<64x32xf32>
    %c0_20 = arith.constant 0 : index
    %c0_21 = arith.constant 0 : index
    %c0_22 = arith.constant 0 : index
    %41 = vector.load %arg5[%c0_20, %c0_21, %c0_22] : memref<2x16x64xf32, #tpu.memory_space<vmem>>, vector<1x16x64xf32>
    %42 = vector.shape_cast %41 : vector<1x16x64xf32> to vector<16x64xf32>
    %cst_23 = arith.constant dense<0.000000e+00> : vector<16x32xf32>
    %43 = tpu.matmul %42, %40, %cst_23 {dimension_numbers = #tpu.dot_dimension_numbers<[1], [0], [0], [1], [0, 0, 1, 1], [], []>} : vector<16x64xf32>, vector<64x32xf32>, vector<16x32xf32> -> vector<16x32xf32>
    %c0_24 = arith.constant 0 : index
    %c64 = arith.constant 64 : index
    %c0_25 = arith.constant 0 : index
    %44 = vector.load %arg3[%c0_24, %c64, %c0_25] : memref<2x80x32xf32, #tpu.memory_space<vmem>>, vector<1x16x32xf32>
    %45 = vector.shape_cast %44 : vector<1x16x32xf32> to vector<16x32xf32>
    %46 = arith.addf %43, %45 : vector<16x32xf32>
    %47 = arith.addf %2, %46 : vector<16x32xf32>
    %c4 = arith.constant 4 : index
    %c0_26 = arith.constant 0 : index
    %48 = vector.load %arg2[%c4, %c0_26] : memref<14x32xf32, #tpu.memory_space<vmem>>, vector<1x32xf32>
    %c6 = arith.constant 6 : index
    %c0_27 = arith.constant 0 : index
    %49 = vector.load %arg2[%c6, %c0_27] : memref<14x32xf32, #tpu.memory_space<vmem>>, vector<1x32xf32>
    %cst_28 = arith.constant dense<0.000000e+00> : vector<16xf32>
    %50 = vector.multi_reduction <add>, %47, %cst_28 [1] : vector<16x32xf32> to vector<16xf32>
    %51 = vector.shape_cast %50 : vector<16xf32> to vector<16x1xf32>
    %cst_29 = arith.constant 3.200000e+01 : f32
    %52 = vector.broadcast %cst_29 : f32 to vector<16x1xf32>
    %53 = arith.divf %51, %52 : vector<16x1xf32>
    %54 = vector.broadcast %53 : vector<16x1xf32> to vector<16x32xf32>
    %55 = arith.subf %47, %54 : vector<16x32xf32>
    %56 = arith.mulf %55, %55 : vector<16x32xf32>
    %cst_30 = arith.constant dense<0.000000e+00> : vector<16xf32>
    %57 = vector.multi_reduction <add>, %56, %cst_30 [1] : vector<16x32xf32> to vector<16xf32>
    %58 = vector.shape_cast %57 : vector<16xf32> to vector<16x1xf32>
    %cst_31 = arith.constant 3.200000e+01 : f32
    %59 = vector.broadcast %cst_31 : f32 to vector<16x1xf32>
    %60 = arith.divf %58, %59 : vector<16x1xf32>
    %61 = vector.broadcast %53 : vector<16x1xf32> to vector<16x32xf32>
    %62 = arith.subf %47, %61 : vector<16x32xf32>
    %cst_32 = arith.constant 9.99999974E-6 : f32
    %63 = vector.broadcast %cst_32 : f32 to vector<16x1xf32>
    %64 = arith.addf %60, %63 : vector<16x1xf32>
    %65 = math.rsqrt %64 : vector<16x1xf32>
    %66 = vector.broadcast %65 : vector<16x1xf32> to vector<16x32xf32>
    %67 = arith.mulf %62, %66 : vector<16x32xf32>
    %68 = vector.broadcast %48 : vector<1x32xf32> to vector<16x32xf32>
    %69 = arith.mulf %67, %68 : vector<16x32xf32>
    %70 = vector.broadcast %49 : vector<1x32xf32> to vector<16x32xf32>
    %71 = arith.addf %69, %70 : vector<16x32xf32>
    %c0_33 = arith.constant 0 : index
    %c0_34 = arith.constant 0 : index
    %c0_35 = arith.constant 0 : index
    %72 = vector.load %arg6[%c0_33, %c0_34, %c0_35] : memref<2x32x32xf32, #tpu.memory_space<vmem>>, vector<1x32x32xf32>
    %73 = vector.shape_cast %72 : vector<1x32x32xf32> to vector<32x32xf32>
    %cst_36 = arith.constant dense<0.000000e+00> : vector<16x32xf32>
    %74 = tpu.matmul %71, %73, %cst_36 {dimension_numbers = #tpu.dot_dimension_numbers<[1], [0], [0], [1], [0, 0, 1, 1], [], []>} : vector<16x32xf32>, vector<32x32xf32>, vector<16x32xf32> -> vector<16x32xf32>
    %c8 = arith.constant 8 : index
    %c0_37 = arith.constant 0 : index
    %75 = vector.load %arg2[%c8, %c0_37] : memref<14x32xf32, #tpu.memory_space<vmem>>, vector<1x32xf32>
    %76 = vector.broadcast %75 : vector<1x32xf32> to vector<16x32xf32>
    %77 = arith.addf %74, %76 : vector<16x32xf32>
    %cst_38 = arith.constant 5.000000e-01 : f32
    %78 = vector.broadcast %cst_38 : f32 to vector<16x32xf32>
    %79 = arith.mulf %78, %77 : vector<16x32xf32>
    %cst_39 = arith.constant 0.707106769 : f32
    %80 = vector.broadcast %cst_39 : f32 to vector<16x32xf32>
    %81 = arith.mulf %77, %80 : vector<16x32xf32>
    %82 = math.erf %81 : vector<16x32xf32>
    %cst_40 = arith.constant 1.000000e+00 : f32
    %83 = vector.broadcast %cst_40 : f32 to vector<16x32xf32>
    %84 = arith.addf %83, %82 : vector<16x32xf32>
    %85 = arith.mulf %79, %84 : vector<16x32xf32>
    %c0_41 = arith.constant 0 : index
    %c0_42 = arith.constant 0 : index
    %c0_43 = arith.constant 0 : index
    %86 = vector.load %arg7[%c0_41, %c0_42, %c0_43] : memref<2x32x32xf32, #tpu.memory_space<vmem>>, vector<1x32x32xf32>
    %87 = vector.shape_cast %86 : vector<1x32x32xf32> to vector<32x32xf32>
    %cst_44 = arith.constant dense<0.000000e+00> : vector<16x32xf32>
    %88 = tpu.matmul %85, %87, %cst_44 {dimension_numbers = #tpu.dot_dimension_numbers<[1], [0], [0], [1], [0, 0, 1, 1], [], []>} : vector<16x32xf32>, vector<32x32xf32>, vector<16x32xf32> -> vector<16x32xf32>
    %c10 = arith.constant 10 : index
    %c0_45 = arith.constant 0 : index
    %89 = vector.load %arg2[%c10, %c0_45] : memref<14x32xf32, #tpu.memory_space<vmem>>, vector<1x32xf32>
    %90 = vector.broadcast %89 : vector<1x32xf32> to vector<16x32xf32>
    %91 = arith.addf %88, %90 : vector<16x32xf32>
    %92 = arith.addf %47, %91 : vector<16x32xf32>
    %93 = arith.mulf %92, %1 : vector<16x32xf32>
    %c1 = arith.constant 1 : index
    %c0_46 = arith.constant 0 : index
    %94 = vector.load %arg2[%c1, %c0_46] : memref<14x32xf32, #tpu.memory_space<vmem>>, vector<1x32xf32>
    %c3 = arith.constant 3 : index
    %c0_47 = arith.constant 0 : index
    %95 = vector.load %arg2[%c3, %c0_47] : memref<14x32xf32, #tpu.memory_space<vmem>>, vector<1x32xf32>
    %cst_48 = arith.constant dense<0.000000e+00> : vector<16xf32>
    %96 = vector.multi_reduction <add>, %93, %cst_48 [1] : vector<16x32xf32> to vector<16xf32>
    %97 = vector.shape_cast %96 : vector<16xf32> to vector<16x1xf32>
    %cst_49 = arith.constant 3.200000e+01 : f32
    %98 = vector.broadcast %cst_49 : f32 to vector<16x1xf32>
    %99 = arith.divf %97, %98 : vector<16x1xf32>
    %100 = vector.broadcast %99 : vector<16x1xf32> to vector<16x32xf32>
    %101 = arith.subf %93, %100 : vector<16x32xf32>
    %102 = arith.mulf %101, %101 : vector<16x32xf32>
    %cst_50 = arith.constant dense<0.000000e+00> : vector<16xf32>
    %103 = vector.multi_reduction <add>, %102, %cst_50 [1] : vector<16x32xf32> to vector<16xf32>
    %104 = vector.shape_cast %103 : vector<16xf32> to vector<16x1xf32>
    %cst_51 = arith.constant 3.200000e+01 : f32
    %105 = vector.broadcast %cst_51 : f32 to vector<16x1xf32>
    %106 = arith.divf %104, %105 : vector<16x1xf32>
    %107 = vector.broadcast %99 : vector<16x1xf32> to vector<16x32xf32>
    %108 = arith.subf %93, %107 : vector<16x32xf32>
    %cst_52 = arith.constant 9.99999974E-6 : f32
    %109 = vector.broadcast %cst_52 : f32 to vector<16x1xf32>
    %110 = arith.addf %106, %109 : vector<16x1xf32>
    %111 = math.rsqrt %110 : vector<16x1xf32>
    %112 = vector.broadcast %111 : vector<16x1xf32> to vector<16x32xf32>
    %113 = arith.mulf %108, %112 : vector<16x32xf32>
    %114 = vector.broadcast %94 : vector<1x32xf32> to vector<16x32xf32>
    %115 = arith.mulf %113, %114 : vector<16x32xf32>
    %116 = vector.broadcast %95 : vector<1x32xf32> to vector<16x32xf32>
    %117 = arith.addf %115, %116 : vector<16x32xf32>
    %c1_53 = arith.constant 1 : index
    %c0_54 = arith.constant 0 : index
    %c0_55 = arith.constant 0 : index
    %118 = vector.load %arg4[%c1_53, %c0_54, %c0_55] : memref<2x64x16xf32, #tpu.memory_space<vmem>>, vector<1x64x16xf32>
    %119 = vector.shape_cast %118 : vector<1x64x16xf32> to vector<64x16xf32>
    %cst_56 = arith.constant dense<0.000000e+00> : vector<64x32xf32>
    %120 = tpu.matmul %119, %117, %cst_56 {dimension_numbers = #tpu.dot_dimension_numbers<[1], [0], [0], [1], [0, 0, 1, 1], [], []>} : vector<64x16xf32>, vector<16x32xf32>, vector<64x32xf32> -> vector<64x32xf32>
    %c1_57 = arith.constant 1 : index
    %c0_58 = arith.constant 0 : index
    %c0_59 = arith.constant 0 : index
    %121 = vector.load %arg3[%c1_57, %c0_58, %c0_59] : memref<2x80x32xf32, #tpu.memory_space<vmem>>, vector<1x64x32xf32>
    %122 = vector.shape_cast %121 : vector<1x64x32xf32> to vector<64x32xf32>
    %123 = arith.addf %120, %122 : vector<64x32xf32>
    %cst_60 = arith.constant 5.000000e-01 : f32
    %124 = vector.broadcast %cst_60 : f32 to vector<64x32xf32>
    %125 = arith.mulf %124, %123 : vector<64x32xf32>
    %cst_61 = arith.constant 0.707106769 : f32
    %126 = vector.broadcast %cst_61 : f32 to vector<64x32xf32>
    %127 = arith.mulf %123, %126 : vector<64x32xf32>
    %128 = math.erf %127 : vector<64x32xf32>
    %cst_62 = arith.constant 1.000000e+00 : f32
    %129 = vector.broadcast %cst_62 : f32 to vector<64x32xf32>
    %130 = arith.addf %129, %128 : vector<64x32xf32>
    %131 = arith.mulf %125, %130 : vector<64x32xf32>
    %c1_63 = arith.constant 1 : index
    %c0_64 = arith.constant 0 : index
    %c0_65 = arith.constant 0 : index
    %132 = vector.load %arg5[%c1_63, %c0_64, %c0_65] : memref<2x16x64xf32, #tpu.memory_space<vmem>>, vector<1x16x64xf32>
    %133 = vector.shape_cast %132 : vector<1x16x64xf32> to vector<16x64xf32>
    %cst_66 = arith.constant dense<0.000000e+00> : vector<16x32xf32>
    %134 = tpu.matmul %133, %131, %cst_66 {dimension_numbers = #tpu.dot_dimension_numbers<[1], [0], [0], [1], [0, 0, 1, 1], [], []>} : vector<16x64xf32>, vector<64x32xf32>, vector<16x32xf32> -> vector<16x32xf32>
    %c1_67 = arith.constant 1 : index
    %c64_68 = arith.constant 64 : index
    %c0_69 = arith.constant 0 : index
    %135 = vector.load %arg3[%c1_67, %c64_68, %c0_69] : memref<2x80x32xf32, #tpu.memory_space<vmem>>, vector<1x16x32xf32>
    %136 = vector.shape_cast %135 : vector<1x16x32xf32> to vector<16x32xf32>
    %137 = arith.addf %134, %136 : vector<16x32xf32>
    %138 = arith.addf %93, %137 : vector<16x32xf32>
    %c5 = arith.constant 5 : index
    %c0_70 = arith.constant 0 : index
    %139 = vector.load %arg2[%c5, %c0_70] : memref<14x32xf32, #tpu.memory_space<vmem>>, vector<1x32xf32>
    %c7 = arith.constant 7 : index
    %c0_71 = arith.constant 0 : index
    %140 = vector.load %arg2[%c7, %c0_71] : memref<14x32xf32, #tpu.memory_space<vmem>>, vector<1x32xf32>
    %cst_72 = arith.constant dense<0.000000e+00> : vector<16xf32>
    %141 = vector.multi_reduction <add>, %138, %cst_72 [1] : vector<16x32xf32> to vector<16xf32>
    %142 = vector.shape_cast %141 : vector<16xf32> to vector<16x1xf32>
    %cst_73 = arith.constant 3.200000e+01 : f32
    %143 = vector.broadcast %cst_73 : f32 to vector<16x1xf32>
    %144 = arith.divf %142, %143 : vector<16x1xf32>
    %145 = vector.broadcast %144 : vector<16x1xf32> to vector<16x32xf32>
    %146 = arith.subf %138, %145 : vector<16x32xf32>
    %147 = arith.mulf %146, %146 : vector<16x32xf32>
    %cst_74 = arith.constant dense<0.000000e+00> : vector<16xf32>
    %148 = vector.multi_reduction <add>, %147, %cst_74 [1] : vector<16x32xf32> to vector<16xf32>
    %149 = vector.shape_cast %148 : vector<16xf32> to vector<16x1xf32>
    %cst_75 = arith.constant 3.200000e+01 : f32
    %150 = vector.broadcast %cst_75 : f32 to vector<16x1xf32>
    %151 = arith.divf %149, %150 : vector<16x1xf32>
    %152 = vector.broadcast %144 : vector<16x1xf32> to vector<16x32xf32>
    %153 = arith.subf %138, %152 : vector<16x32xf32>
    %cst_76 = arith.constant 9.99999974E-6 : f32
    %154 = vector.broadcast %cst_76 : f32 to vector<16x1xf32>
    %155 = arith.addf %151, %154 : vector<16x1xf32>
    %156 = math.rsqrt %155 : vector<16x1xf32>
    %157 = vector.broadcast %156 : vector<16x1xf32> to vector<16x32xf32>
    %158 = arith.mulf %153, %157 : vector<16x32xf32>
    %159 = vector.broadcast %139 : vector<1x32xf32> to vector<16x32xf32>
    %160 = arith.mulf %158, %159 : vector<16x32xf32>
    %161 = vector.broadcast %140 : vector<1x32xf32> to vector<16x32xf32>
    %162 = arith.addf %160, %161 : vector<16x32xf32>
    %c1_77 = arith.constant 1 : index
    %c0_78 = arith.constant 0 : index
    %c0_79 = arith.constant 0 : index
    %163 = vector.load %arg6[%c1_77, %c0_78, %c0_79] : memref<2x32x32xf32, #tpu.memory_space<vmem>>, vector<1x32x32xf32>
    %164 = vector.shape_cast %163 : vector<1x32x32xf32> to vector<32x32xf32>
    %cst_80 = arith.constant dense<0.000000e+00> : vector<16x32xf32>
    %165 = tpu.matmul %162, %164, %cst_80 {dimension_numbers = #tpu.dot_dimension_numbers<[1], [0], [0], [1], [0, 0, 1, 1], [], []>} : vector<16x32xf32>, vector<32x32xf32>, vector<16x32xf32> -> vector<16x32xf32>
    %c9 = arith.constant 9 : index
    %c0_81 = arith.constant 0 : index
    %166 = vector.load %arg2[%c9, %c0_81] : memref<14x32xf32, #tpu.memory_space<vmem>>, vector<1x32xf32>
    %167 = vector.broadcast %166 : vector<1x32xf32> to vector<16x32xf32>
    %168 = arith.addf %165, %167 : vector<16x32xf32>
    %cst_82 = arith.constant 5.000000e-01 : f32
    %169 = vector.broadcast %cst_82 : f32 to vector<16x32xf32>
    %170 = arith.mulf %169, %168 : vector<16x32xf32>
    %cst_83 = arith.constant 0.707106769 : f32
    %171 = vector.broadcast %cst_83 : f32 to vector<16x32xf32>
    %172 = arith.mulf %168, %171 : vector<16x32xf32>
    %173 = math.erf %172 : vector<16x32xf32>
    %cst_84 = arith.constant 1.000000e+00 : f32
    %174 = vector.broadcast %cst_84 : f32 to vector<16x32xf32>
    %175 = arith.addf %174, %173 : vector<16x32xf32>
    %176 = arith.mulf %170, %175 : vector<16x32xf32>
    %c1_85 = arith.constant 1 : index
    %c0_86 = arith.constant 0 : index
    %c0_87 = arith.constant 0 : index
    %177 = vector.load %arg7[%c1_85, %c0_86, %c0_87] : memref<2x32x32xf32, #tpu.memory_space<vmem>>, vector<1x32x32xf32>
    %178 = vector.shape_cast %177 : vector<1x32x32xf32> to vector<32x32xf32>
    %cst_88 = arith.constant dense<0.000000e+00> : vector<16x32xf32>
    %179 = tpu.matmul %176, %178, %cst_88 {dimension_numbers = #tpu.dot_dimension_numbers<[1], [0], [0], [1], [0, 0, 1, 1], [], []>} : vector<16x32xf32>, vector<32x32xf32>, vector<16x32xf32> -> vector<16x32xf32>
    %c11 = arith.constant 11 : index
    %c0_89 = arith.constant 0 : index
    %180 = vector.load %arg2[%c11, %c0_89] : memref<14x32xf32, #tpu.memory_space<vmem>>, vector<1x32xf32>
    %181 = vector.broadcast %180 : vector<1x32xf32> to vector<16x32xf32>
    %182 = arith.addf %179, %181 : vector<16x32xf32>
    %183 = arith.addf %138, %182 : vector<16x32xf32>
    %c12 = arith.constant 12 : index
    %c0_90 = arith.constant 0 : index
    %184 = vector.load %arg2[%c12, %c0_90] : memref<14x32xf32, #tpu.memory_space<vmem>>, vector<1x32xf32>
    %c13 = arith.constant 13 : index
    %c0_91 = arith.constant 0 : index
    %185 = vector.load %arg2[%c13, %c0_91] : memref<14x32xf32, #tpu.memory_space<vmem>>, vector<1x32xf32>
    %cst_92 = arith.constant dense<0.000000e+00> : vector<16xf32>
    %186 = vector.multi_reduction <add>, %183, %cst_92 [1] : vector<16x32xf32> to vector<16xf32>
    %187 = vector.shape_cast %186 : vector<16xf32> to vector<16x1xf32>
    %cst_93 = arith.constant 3.200000e+01 : f32
    %188 = vector.broadcast %cst_93 : f32 to vector<16x1xf32>
    %189 = arith.divf %187, %188 : vector<16x1xf32>
    %190 = vector.broadcast %189 : vector<16x1xf32> to vector<16x32xf32>
    %191 = arith.subf %183, %190 : vector<16x32xf32>
    %192 = arith.mulf %191, %191 : vector<16x32xf32>
    %cst_94 = arith.constant dense<0.000000e+00> : vector<16xf32>
    %193 = vector.multi_reduction <add>, %192, %cst_94 [1] : vector<16x32xf32> to vector<16xf32>
    %194 = vector.shape_cast %193 : vector<16xf32> to vector<16x1xf32>
    %cst_95 = arith.constant 3.200000e+01 : f32
    %195 = vector.broadcast %cst_95 : f32 to vector<16x1xf32>
    %196 = arith.divf %194, %195 : vector<16x1xf32>
    %197 = vector.broadcast %189 : vector<16x1xf32> to vector<16x32xf32>
    %198 = arith.subf %183, %197 : vector<16x32xf32>
    %cst_96 = arith.constant 9.99999974E-6 : f32
    %199 = vector.broadcast %cst_96 : f32 to vector<16x1xf32>
    %200 = arith.addf %196, %199 : vector<16x1xf32>
    %201 = math.rsqrt %200 : vector<16x1xf32>
    %202 = vector.broadcast %201 : vector<16x1xf32> to vector<16x32xf32>
    %203 = arith.mulf %198, %202 : vector<16x32xf32>
    %204 = vector.broadcast %184 : vector<1x32xf32> to vector<16x32xf32>
    %205 = arith.mulf %203, %204 : vector<16x32xf32>
    %206 = vector.broadcast %185 : vector<1x32xf32> to vector<16x32xf32>
    %207 = arith.addf %205, %206 : vector<16x32xf32>
    %c0_97 = arith.constant 0 : index
    %c0_98 = arith.constant 0 : index
    %208 = vector.load %arg8[%c0_97, %c0_98] : memref<16x32xf32, #tpu.memory_space<vmem>>, vector<16x32xf32>
    tpu.vector_store %arg8[%c0_97, %c0_98], %207 {strides = array<i32>} : memref<16x32xf32, #tpu.memory_space<vmem>>, vector<16x32xf32>,
    return
  }
}

</mosaic_0001>

<bundles_post_ra>
// kernel: tpu_custom_call.1
= control target key start
LH: loop header
LB: loop body
LE: loop exit
PB: predicated region body
PF: predicated region fallthrough
CT: control target
= control target key end

     0   :  { %vm38_vm0 = vcmask 261120   ;;  %s1897_s0 = inlined_call_operand.vmem [shape: f32[16,32], index: 0, kind: input, shape index: {}]   ;;  %s1898_s1 = inlined_call_operand.vmem [shape: f32[16,32], index: 1, kind: input, shape index: {}]   ;;  %s1899_s2 = inlined_call_operand.vmem [shape: f32[14,32], index: 2, kind: input, shape index: {}]   ;;  %s1900_s3 = inlined_call_operand.vmem [shape: f32[2,80,32], index: 3, kind: input, shape index: {}]   ;;  %s1901_s4 = inlined_call_operand.vmem [shape: f32[2,64,16], index: 4, kind: input, shape index: {}]   ;;  %s1902_s5 = inlined_call_operand.vmem [shape: f32[2,16,64], index: 5, kind: input, shape index: {}]   ;;  %s1903_s6 = inlined_call_operand.vmem [shape: f32[2,32,32], index: 6, kind: input, shape index: {}]   ;;  %s1904_s7 = inlined_call_operand.vmem [shape: f32[2,32,32], index: 7, kind: input, shape index: {}]   ;;  %s1905_s8 = inlined_call_operand.hbm [shape: f32[16,32], index: 8, kind: output, shape index: {}]  }
   0x1   :  { %v31_v0 = vld [vmem:[%s1898_s1 + $0x8] sm:$0xff]  ;;  %v30_v2 = vld [vmem:[%s1898_s1] sm:$0xff] }
   0x2   :  { %v1580_v1 = vld [vmem:[%s1897_s0 + $0x8] sm:$0xff]  ;;  %v1591_v4 = vld [vmem:[%s1897_s0] sm:$0xff] }
   0x3   :  { %v1586_v3 = vmul.f32 %v1580_v1, %v31_v0 }
   0x4   :  { %13 = vsyncpa [#allocation3], 0  ;;  %v1594_v5 = vmul.f32 %v1591_v4, %v30_v2  ;;  %v78_v18 = vld [vmem:[%s1901_s4] sm:$0xff]  ;;  %vm94_vm1 = vcmask 130048   ;;  %v79_v35 = vld [vmem:[%s1901_s4 + $0x8] sm:$0xff]  ;;  %vm268_vm2 = vcmask 523264  }
   0x5   :  { %v42_v6 = vsel %vm38_vm0, %v1586_v3, 0.0  ;;  %1331 = vmatprep.mubr.msk.f32.mxu0 %vm94_vm1, %v78_v18  ;;  %v1193_v26 = vld [vmem:[%s1899_s2] ss:$0 sm:$0xff]  ;;  %v1194_v28 = vld [vmem:[%s1899_s2 + $0x2] ss:$0 sm:$0xff]  ;;  %v80_v36 = vld [vmem:[%s1901_s4 + $0x10] sm:$0xff] }
   0x6   :  { %43 = vadd.xlane.f32.xlu0 %v42_v6  ;;  %v39_v7 = vsel %vm38_vm0, %v1594_v5, 0.0  ;;  %v81_v37 = vld [vmem:[%s1901_s4 + $0x18] sm:$0xff]  ;;  %v82_v38 = vld [vmem:[%s1901_s4 + $0x20] sm:$0xff]  ;;  %v83_v39 = vld [vmem:[%s1901_s4 + $0x28] sm:$0xff]  ;;  %s1526_s25 = smov [#allocation2]  }
   0x7   :  { %v84_v40 = vld [vmem:[%s1901_s4 + $0x30] sm:$0xff]  ;;  %v85_v41 = vld [vmem:[%s1901_s4 + $0x38] sm:$0xff]  ;;  %v264_v42 = vld [vmem:[%s1902_s5] sm:$0xff] }
   0x8   :  { %1359 = vmatprep.mubr.msk.f32.mxu1 %vm268_vm2, %v264_v42  ;;  %v91_v47 = vld [vmem:[%s1900_s3 + $0x28] sm:$0xff]  ;;  %v90_v49 = vld [vmem:[%s1900_s3 + $0x20] sm:$0xff]  ;;  %v89_v51 = vld [vmem:[%s1900_s3 + $0x18] sm:$0xff] }
   0x9   :  { %v93_v53 = vld [vmem:[%s1900_s3 + $0x38] sm:$0xff]  ;;  %v88_v55 = vld [vmem:[%s1900_s3 + $0x10] sm:$0xff]  ;;  %v87_v61 = vld [vmem:[%s1900_s3 + $0x8] sm:$0xff] }
   0xa   :  { %40 = vadd.xlane.f32.xlu0 %v39_v7  ;;  %v92_v58 = vld [vmem:[%s1900_s3 + $0x30] sm:$0xff]  ;;  %v86_v7 = vld [vmem:[%s1900_s3] sm:$0xff] }
  0x8f   :  { %v44_v8 = vpop.xlane.xlu0 %43 }
  0x90   :  { %v47_v9 = vmul.f32 0.03125, %v44_v8 }
  0x92   :  { %v49_v10 = vsub.f32 %v1586_v3, %v47_v9 }
  0x93   :  { %v41_v11 = vpop.xlane.xlu0 %40 }
  0x94   :  { %v46_v12 = vmul.f32 0.03125, %v41_v11  ;;  %v51_v13 = vmul.f32 %v49_v10, %v49_v10 }
  0x96   :  { %v48_v14 = vsub.f32 %v1594_v5, %v46_v12  ;;  %v55_v15 = vsel %vm38_vm0, %v51_v13, 0.0 }
  0x97   :  { %56 = vadd.xlane.f32.xlu1 %v55_v15 }
  0x98   :  { %v50_v16 = vmul.f32 %v48_v14, %v48_v14 }
  0x9a   :  { %v52_v17 = vsel %vm38_vm0, %v50_v16, 0.0 }
  0x9b   :  { %53 = vadd.xlane.f32.xlu1 %v52_v17 }
 0x120   :  { %v57_v19 = vpop.xlane.xlu1 %56 }
 0x121   :  { %v59_v20 = vmul.f32 0.03125, %v57_v19 }
 0x123   :  { %v61_v21 = vadd.f32 1e-05, %v59_v20 }
 0x124   :  { %v54_v22 = vpop.xlane.xlu1 %53 }
 0x125   :  { %1444 = vrsqrt.f32 %v61_v21  ;;  %v58_v23 = vmul.f32 0.03125, %v54_v22 }
 0x127   :  { %v60_v24 = vadd.f32 1e-05, %v58_v23 }
 0x129   :  { %1446 = vrsqrt.f32 %v60_v24 }
 0x132   :  { %v1445_v25 = vpop.eup %1444 }
 0x133   :  { %v65_v27 = vmul.f32 %v1445_v25, %v49_v10 }
 0x135   :  { %v71_v29 = vmul.f32 %v1193_v26, %v65_v27 }
 0x136   :  { %v1447_v30 = vpop.eup %1446 }
 0x137   :  { %v64_v31 = vmul.f32 %v1447_v30, %v48_v14  ;;  %v77_v32 = vadd.f32 %v1194_v28, %v71_v29 }
 0x139   :  { %v70_v33 = vmul.f32 %v1193_v26, %v64_v31  ;;  %1327 = vmatprep.subr.mxu0 %v77_v32 }
 0x13a   :  { %1328 = vmatpush3.msra.mxu0 %v77_v32 }
 0x13b   :  { %v76_v34 = vadd.f32 %v1194_v28, %v70_v33 }
 0x13d   :  { %1329 = vmatprep.subr.mxu0 %v76_v34 }
 0x13e   :  { %1330 = vmatpush3.msra.mxu0 %v76_v34 }
 0x13f   :  { %1332 = vmatmul.mubr.msk.f32.vlgmr.msra.gmra.mxu0 %vm94_vm1, %v79_v35 }
 0x140   :  { %1334 = vmatprep.mubr.msk.f32.mxu0 %vm94_vm1, %v80_v36 }
 0x143   :  { %1335 = vmatmul.mubr.msk.f32.gmra.mxu0 %vm94_vm1, %v81_v37 }
 0x144   :  { %1337 = vmatprep.mubr.msk.f32.mxu0 %vm94_vm1, %v82_v38 }
 0x147   :  { %1338 = vmatmul.mubr.msk.f32.gmra.mxu0 %vm94_vm1, %v83_v39 }
 0x148   :  { %1340 = vmatprep.mubr.msk.f32.mxu0 %vm94_vm1, %v84_v40 }
 0x14b   :  { %1341 = vmatmul.mubr.msk.f32.gmra.mxu0 %vm94_vm1, %v85_v41 }
 0x1ff   :  { %v1333_v43 = vpop.f32.mrf.mxu0 }
 0x200   :  { %v191_v8 = vadd.f32 %v1333_v43, %v87_v61 }
 0x201   :  { %v185_v44 = vpop.f32.mrf.mxu0 }
 0x202   :  { %v186_v11 = vadd.f32 %v185_v44, %v86_v7  ;;  %v233_v13 = vmul.f32 0.70710677, %v191_v8  ;;  %v225_v41 = vmul.f32 0.5, %v191_v8  ;;  %v394_v7 = vld [vmem:[%s1903_s6 + $0x10] sm:$0xff]  ;;  %v393_v8 = vld [vmem:[%s1903_s6 + $0x8] sm:$0xff] }
 0x203   :  { %v1336_v45 = vpop.f32.mrf.mxu0 }
 0x204   :  { %v201_v59 = vadd.f32 %v1336_v45, %v89_v51  ;;  %v232_v14 = vmul.f32 0.70710677, %v186_v11  ;;  %v224_v44 = vmul.f32 0.5, %v186_v11 }
 0x205   :  { %v195_v46 = vpop.f32.mrf.mxu0 }
 0x206   :  { %v196_v0 = vadd.f32 %v195_v46, %v88_v55  ;;  %v235_v9 = vmul.f32 0.70710677, %v201_v59  ;;  %v227_v34 = vmul.f32 0.5, %v201_v59 }
 0x207   :  { %v1339_v48 = vpop.f32.mrf.mxu0 }
 0x208   :  { %v211_v50 = vadd.f32 %v1339_v48, %v91_v47  ;;  %v234_v12 = vmul.f32 0.70710677, %v196_v0  ;;  %v226_v38 = vmul.f32 0.5, %v196_v0  ;;  %v265_v47 = vld [vmem:[%s1902_s5 + $0x8] sm:$0xff] }
 0x209   :  { %v205_v52 = vpop.f32.mrf.mxu0  ;;  %v267_v48 = vld [vmem:[%s1900_s3 + $0x48] sm:$0xff] }
 0x20a   :  { %v206_v54 = vadd.f32 %v205_v52, %v90_v49  ;;  %v237_v56 = vmul.f32 0.70710677, %v211_v50  ;;  %v229_v26 = vmul.f32 0.5, %v211_v50  ;;  %v266_v50 = vld [vmem:[%s1900_s3 + $0x40] sm:$0xff] }
 0x20b   :  { %v1342_v57 = vpop.f32.mrf.mxu0 }
 0x20c   :  { %v221_v60 = vadd.f32 %v1342_v57, %v93_v53  ;;  %v236_v62 = vmul.f32 0.70710677, %v206_v54  ;;  %1448 = verf.f32 %v237_v56  ;;  %v228_v30 = vmul.f32 0.5, %v206_v54 }
 0x20d   :  { %v215_v63 = vpop.f32.mrf.mxu0 }
 0x20e   :  { %v239_v2 = vmul.f32 0.70710677, %v221_v60  ;;  %v216_v6 = vadd.f32 %v215_v63, %v92_v58  ;;  %v231_v18 = vmul.f32 0.5, %v221_v60 }
 0x210   :  { %1450 = verf.f32 %v239_v2  ;;  %v238_v10 = vmul.f32 0.70710677, %v216_v6  ;;  %v230_v21 = vmul.f32 0.5, %v216_v6  ;;  %v395_v6 = vld [vmem:[%s1903_s6 + $0x18] sm:$0xff] }
 0x211   :  { %1452 = verf.f32 %v236_v62  ;;  %1362 = vmatprep.subr.mxu0 %v395_v6 }
 0x212   :  { %1454 = verf.f32 %v238_v10  ;;  %1363 = vmatpush3.msra.mxu0 %v395_v6 }
 0x213   :  { %1456 = verf.f32 %v235_v9  ;;  %1364 = vmatprep.subr.mxu0 %v394_v7  ;;  %v392_v9 = vld [vmem:[%s1903_s6] sm:$0xff] }
 0x214   :  { %1458 = verf.f32 %v234_v12  ;;  %1365 = vmatpush3.msra.mxu0 %v394_v7 }
 0x215   :  { %1460 = verf.f32 %v233_v13  ;;  %1366 = vmatprep.subr.mxu0 %v393_v8 }
 0x216   :  { %1462 = verf.f32 %v232_v14  ;;  %1367 = vmatpush3.msra.mxu0 %v393_v8 }
 0x217   :  { %1368 = vmatprep.subr.mxu0 %v392_v9 }
 0x218   :  { %1369 = vmatpush3.msra.mxu0 %v392_v9 }
 0x219   :  { %v1449_v15 = vpop.eup %1448 }
 0x21a   :  { %v253_v24 = vadd.f32 1.0, %v1449_v15 }
 0x21c   :  { %v261_v31 = vmul.f32 %v253_v24, %v229_v26  ;;  %v495_v26 = vld [vmem:[%s1904_s7 + $0x18] sm:$0xff] }
 0x21d   :  { %v1451_v16 = vpop.eup %1450 }
 0x21e   :  { %v1453_v17 = vpop.eup %1452  ;;  %v255_v19 = vadd.f32 1.0, %v1451_v16 }
 0x21f   :  { %v1455_v20 = vpop.eup %1454  ;;  %v252_v28 = vadd.f32 1.0, %v1453_v17  ;;  %v1205_v17 = vld [vmem:[%s1899_s2 + $0x4] ss:$0 sm:$0xff] }
 0x220   :  { %v263_v22 = vmul.f32 %v255_v19, %v231_v18  ;;  %v254_v23 = vadd.f32 1.0, %v1455_v20  ;;  %v1457_v25 = vpop.eup %1456 }
 0x221   :  { %v1459_v29 = vpop.eup %1458  ;;  %v251_v32 = vadd.f32 1.0, %v1457_v25  ;;  %v260_v35 = vmul.f32 %v252_v28, %v228_v30  ;;  %v493_v28 = vld [vmem:[%s1904_s7 + $0x8] sm:$0xff] }
 0x222   :  { %1343 = vmatprep.subr.mxu1 %v263_v22  ;;  %v262_v27 = vmul.f32 %v254_v23, %v230_v21  ;;  %v1461_v33 = vpop.eup %1460  ;;  %v250_v36 = vadd.f32 1.0, %v1459_v29  ;;  %v492_v29 = vld [vmem:[%s1904_s7] sm:$0xff]  ;;  %v1207_v30 = vld [vmem:[%s1899_s2 + $0x8] ss:$0 sm:$0xff] }
 0x223   :  { %1344 = vmatpush3.msra.mxu1 %v263_v22  ;;  %v1463_v37 = vpop.eup %1462  ;;  %v259_v39 = vmul.f32 %v251_v32, %v227_v34  ;;  %v249_v40 = vadd.f32 1.0, %v1461_v33  ;;  %v1206_v22 = vld [vmem:[%s1899_s2 + $0x6] ss:$0 sm:$0xff] }
 0x224   :  { %1345 = vmatprep.subr.mxu1 %v262_v27  ;;  %v258_v42 = vmul.f32 %v250_v36, %v226_v38  ;;  %v248_v43 = vadd.f32 1.0, %v1463_v37 }
 0x225   :  { %1346 = vmatpush3.msra.mxu1 %v262_v27  ;;  %v257_v45 = vmul.f32 %v249_v40, %v225_v41  ;;  %v494_v27 = vld [vmem:[%s1904_s7 + $0x10] sm:$0xff] }
 0x226   :  { %1347 = vmatprep.subr.mxu1 %v261_v31  ;;  %v256_v46 = vmul.f32 %v248_v43, %v224_v44 }
 0x227   :  { %1348 = vmatpush3.msra.mxu1 %v261_v31 }
 0x228   :  { %1349 = vmatprep.subr.mxu1 %v260_v35 }
 0x229   :  { %1350 = vmatpush3.msra.mxu1 %v260_v35 }
 0x22a   :  { %1351 = vmatprep.subr.mxu1 %v259_v39 }
 0x22b   :  { %1352 = vmatpush3.msra.mxu1 %v259_v39 }
 0x22c   :  { %1353 = vmatprep.subr.mxu1 %v258_v42 }
 0x22d   :  { %1354 = vmatpush3.msra.mxu1 %v258_v42 }
 0x22e   :  { %1355 = vmatprep.subr.mxu1 %v257_v45 }
 0x22f   :  { %1356 = vmatpush3.msra.mxu1 %v257_v45  ;;  %v1210_v45 = vld [vmem:[%s1899_s2 + $0xa] ss:$0 sm:$0xff] }
 0x230   :  { %1357 = vmatprep.subr.mxu1 %v256_v46 }
 0x231   :  { %1358 = vmatpush3.msra.mxu1 %v256_v46 }
 0x232   :  { %1360 = vmatmul.mubr.msk.f32.vlgmr.msra.gmra.mxu1 %vm268_vm2, %v265_v47  ;;  %1373 = vmatprep.subr.mxu1 %v495_v26 }
 0x233   :  { %1374 = vmatpush3.msra.mxu1 %v495_v26  ;;  %v1239_v26 = vld [vmem:[%s1902_s5 + $0x10] sm:$0xff] }
 0x234   :  { %1375 = vmatprep.subr.mxu1 %v494_v27 }
 0x235   :  { %1376 = vmatpush3.msra.mxu1 %v494_v27 }
 0x236   :  { %1377 = vmatprep.subr.mxu1 %v493_v28 }
 0x237   :  { %1378 = vmatpush3.msra.mxu1 %v493_v28 }
 0x238   :  { %1379 = vmatprep.subr.mxu1 %v492_v29 }
 0x239   :  { %1380 = vmatpush3.msra.mxu1 %v492_v29 }
 0x2f2   :  { %v1361_v49 = vpop.f32.mrf.mxu1 }
 0x2f3   :  { %v347_v51 = vadd.f32 %v1361_v49, %v267_v48 }
 0x2f4   :  { %v341_v52 = vpop.f32.mrf.mxu1 }
 0x2f5   :  { %v1681_v53 = vadd.f32 %v347_v51, %v1586_v3  ;;  %v342_v54 = vadd.f32 %v341_v52, %v266_v50 }
 0x2f7   :  { %v1684_v55 = vadd.f32 %v342_v54, %v1594_v5  ;;  %v357_v56 = vsel %vm38_vm0, %v1681_v53, 0.0 }
 0x2f8   :  { %358 = vadd.xlane.f32.xlu1 %v357_v56 }
 0x2f9   :  { %v354_v57 = vsel %vm38_vm0, %v1684_v55, 0.0 }
 0x2fa   :  { %355 = vadd.xlane.f32.xlu0 %v354_v57 }
 0x381   :  { %v359_v58 = vpop.xlane.xlu1 %358 }
 0x382   :  { %v361_v59 = vmul.f32 0.03125, %v359_v58 }
 0x383   :  { %v356_v60 = vpop.xlane.xlu0 %355 }
 0x384   :  { %v363_v61 = vsub.f32 %v1681_v53, %v361_v59  ;;  %v360_v62 = vmul.f32 0.03125, %v356_v60 }
 0x386   :  { %v362_v3 = vsub.f32 %v1684_v55, %v360_v62  ;;  %v365_v63 = vmul.f32 %v363_v61, %v363_v61 }
 0x388   :  { %v369_v5 = vsel %vm38_vm0, %v365_v63, 0.0  ;;  %v364_v0 = vmul.f32 %v362_v3, %v362_v3  ;;  %v1215_v63 = vld [vmem:[%s1901_s4 + $0x40] sm:$0xff] }
 0x389   :  { %370 = vadd.xlane.f32.xlu1 %v369_v5 }
 0x38a   :  { %v366_v2 = vsel %vm38_vm0, %v364_v0, 0.0 }
 0x38b   :  { %367 = vadd.xlane.f32.xlu0 %v366_v2 }
 0x412   :  { %v371_v10 = vpop.xlane.xlu1 %370 }
 0x413   :  { %v373_v11 = vmul.f32 0.03125, %v371_v10  ;;  %v1213_v10 = vld [vmem:[%s1899_s2 + $0x1] ss:$0 sm:$0xff] }
 0x414   :  { %v368_v12 = vpop.xlane.xlu0 %367 }
 0x415   :  { %v375_v13 = vadd.f32 1e-05, %v373_v11  ;;  %v372_v14 = vmul.f32 0.03125, %v368_v12 }
 0x417   :  { %1464 = vrsqrt.f32 %v375_v13  ;;  %v374_v15 = vadd.f32 1e-05, %v372_v14  ;;  %v1214_v13 = vld [vmem:[%s1899_s2 + $0x3] ss:$0 sm:$0xff] }
 0x419   :  { %1466 = vrsqrt.f32 %v374_v15 }
 0x424   :  { %v1465_v16 = vpop.eup %1464 }
 0x425   :  { %v379_v18 = vmul.f32 %v1465_v16, %v363_v61 }
 0x426   :  { %v1467_v19 = vpop.eup %1466 }
 0x427   :  { %v378_v20 = vmul.f32 %v1467_v19, %v362_v3  ;;  %v385_v21 = vmul.f32 %v1205_v17, %v379_v18  ;;  %v1216_v19 = vld [vmem:[%s1901_s4 + $0x48] sm:$0xff] }
 0x429   :  { %v384_v23 = vmul.f32 %v1205_v17, %v378_v20  ;;  %v391_v25 = vadd.f32 %v1206_v22, %v385_v21  ;;  %v1217_v20 = vld [vmem:[%s1901_s4 + $0x50] sm:$0xff]  ;;  %v1218_v21 = vld [vmem:[%s1901_s4 + $0x58] sm:$0xff] }
 0x42b   :  { %v390_v24 = vadd.f32 %v1206_v22, %v384_v23  ;;  %v1219_v22 = vld [vmem:[%s1901_s4 + $0x60] sm:$0xff]  ;;  %v1220_v23 = vld [vmem:[%s1901_s4 + $0x68] sm:$0xff] }
 0x42d   :  { %1370 = vmatprep.mubr.msk.f32.mxu0 %vm38_vm0, %v390_v24  ;;  %v1221_v24 = vld [vmem:[%s1901_s4 + $0x70] sm:$0xff] }
 0x42e   :  { %1371 = vmatmul.mubr.msk.f32.vlgmr.msra.gmra.mxu0 %vm38_vm0, %v391_v25  ;;  %v1222_v25 = vld [vmem:[%s1901_s4 + $0x78] sm:$0xff] }
 0x42f   :  { %1388 = vmatprep.mubr.msk.f32.mxu0 %vm94_vm1, %v1215_v63 }
 0x4ee   :  { %v1372_v31 = vpop.f32.mrf.mxu0 }
 0x4ef   :  { %v479_v32 = vadd.f32 %v1372_v31, %v1207_v30  ;;  %v1228_v31 = vld [vmem:[%s1900_s3 + $0x78] sm:$0xff] }
 0x4f0   :  { %v473_v33 = vpop.f32.mrf.mxu0 }
 0x4f1   :  { %v485_v34 = vmul.f32 0.70710677, %v479_v32  ;;  %v474_v35 = vadd.f32 %v1207_v30, %v473_v33  ;;  %v483_v42 = vmul.f32 0.5, %v479_v32  ;;  %v1227_v33 = vld [vmem:[%s1900_s3 + $0x70] sm:$0xff] }
 0x4f3   :  { %1468 = verf.f32 %v485_v34  ;;  %v484_v36 = vmul.f32 0.70710677, %v474_v35  ;;  %v482_v40 = vmul.f32 0.5, %v474_v35  ;;  %v1226_v35 = vld [vmem:[%s1900_s3 + $0x68] sm:$0xff] }
 0x4f5   :  { %1470 = verf.f32 %v484_v36 }
 0x500   :  { %v1469_v37 = vpop.eup %1468 }
 0x501   :  { %v489_v39 = vadd.f32 1.0, %v1469_v37  ;;  %v1230_v37 = vld [vmem:[%s1900_s3 + $0x88] sm:$0xff] }
 0x502   :  { %v1471_v38 = vpop.eup %1470 }
 0x503   :  { %v488_v41 = vadd.f32 1.0, %v1471_v38  ;;  %v491_v44 = vmul.f32 %v489_v39, %v483_v42  ;;  %v1225_v39 = vld [vmem:[%s1900_s3 + $0x60] sm:$0xff] }
 0x504   :  { %v1229_v42 = vld [vmem:[%s1900_s3 + $0x80] sm:$0xff] }
 0x505   :  { %v490_v43 = vmul.f32 %v488_v41, %v482_v40 }
 0x507   :  { %1381 = vmatprep.mubr.msk.f32.mxu1 %vm38_vm0, %v490_v43 }
 0x508   :  { %1382 = vmatmul.mubr.msk.f32.vlgmr.msra.gmra.mxu1 %vm38_vm0, %v491_v44 }
 0x5c8   :  { %v1383_v46 = vpop.f32.mrf.mxu1 }
 0x5c9   :  { %v579_v47 = vadd.f32 %v1383_v46, %v1210_v45 }
 0x5ca   :  { %v573_v48 = vpop.f32.mrf.mxu1 }
 0x5cb   :  { %v583_v49 = vadd.f32 %v579_v47, %v1681_v53  ;;  %v574_v50 = vadd.f32 %v1210_v45, %v573_v48  ;;  %v1224_v45 = vld [vmem:[%s1900_s3 + $0x58] sm:$0xff] }
 0x5cd   :  { %v1736_v51 = vmul.f32 %v583_v49, %v1580_v1  ;;  %v582_v52 = vadd.f32 %v574_v50, %v1684_v55 }
 0x5cf   :  { %v1740_v54 = vmul.f32 %v582_v52, %v1591_v4  ;;  %v591_v56 = vsel %vm38_vm0, %v1736_v51, 0.0  ;;  %v1223_v52 = vld [vmem:[%s1900_s3 + $0x50] sm:$0xff] }
 0x5d0   :  { %592 = vadd.xlane.f32.xlu0 %v591_v56 }
 0x5d1   :  { %v588_v57 = vsel %vm38_vm0, %v1740_v54, 0.0 }
 0x5d2   :  { %589 = vadd.xlane.f32.xlu1 %v588_v57 }
 0x659   :  { %v593_v58 = vpop.xlane.xlu0 %592 }
 0x65a   :  { %v595_v59 = vmul.f32 0.03125, %v593_v58 }
 0x65b   :  { %v590_v53 = vpop.xlane.xlu1 %589 }
 0x65c   :  { %v597_v60 = vsub.f32 %v1736_v51, %v595_v59  ;;  %v594_v1 = vmul.f32 0.03125, %v590_v53 }
 0x65e   :  { %v596_v61 = vsub.f32 %v1740_v54, %v594_v1  ;;  %v599_v55 = vmul.f32 %v597_v60, %v597_v60 }
 0x660   :  { %v603_v4 = vsel %vm38_vm0, %v599_v55, 0.0  ;;  %v598_v62 = vmul.f32 %v596_v61, %v596_v61 }
 0x661   :  { %604 = vadd.xlane.f32.xlu0 %v603_v4 }
 0x662   :  { %v600_v3 = vsel %vm38_vm0, %v598_v62, 0.0 }
 0x663   :  { %601 = vadd.xlane.f32.xlu1 %v600_v3 }
 0x6ea   :  { %v605_v5 = vpop.xlane.xlu0 %604 }
 0x6eb   :  { %v607_v0 = vmul.f32 0.03125, %v605_v5 }
 0x6ec   :  { %v602_v2 = vpop.xlane.xlu1 %601 }
 0x6ed   :  { %v609_v6 = vadd.f32 1e-05, %v607_v0  ;;  %v606_v7 = vmul.f32 0.03125, %v602_v2 }
 0x6ef   :  { %1472 = vrsqrt.f32 %v609_v6  ;;  %v608_v8 = vadd.f32 1e-05, %v606_v7 }
 0x6f1   :  { %1474 = vrsqrt.f32 %v608_v8 }
 0x6fc   :  { %v1473_v9 = vpop.eup %1472 }
 0x6fd   :  { %v613_v11 = vmul.f32 %v1473_v9, %v597_v60 }
 0x6fe   :  { %v1475_v12 = vpop.eup %1474 }
 0x6ff   :  { %v619_v14 = vmul.f32 %v1213_v10, %v613_v11  ;;  %v612_v15 = vmul.f32 %v1475_v12, %v596_v61 }
 0x701   :  { %v625_v16 = vadd.f32 %v1214_v13, %v619_v14  ;;  %v618_v17 = vmul.f32 %v1213_v10, %v612_v15 }
 0x703   :  { %1384 = vmatprep.subr.mxu0 %v625_v16  ;;  %v624_v18 = vadd.f32 %v1214_v13, %v618_v17 }
 0x704   :  { %1385 = vmatpush3.msra.mxu0 %v625_v16 }
 0x705   :  { %1386 = vmatprep.subr.mxu0 %v624_v18 }
 0x706   :  { %1387 = vmatpush3.msra.mxu0 %v624_v18 }
 0x707   :  { %1389 = vmatmul.mubr.msk.f32.vlgmr.msra.gmra.mxu0 %vm94_vm1, %v1216_v19 }
 0x708   :  { %1391 = vmatprep.mubr.msk.f32.mxu0 %vm94_vm1, %v1217_v20 }
 0x70b   :  { %1392 = vmatmul.mubr.msk.f32.gmra.mxu0 %vm94_vm1, %v1218_v21 }
 0x70c   :  { %1394 = vmatprep.mubr.msk.f32.mxu0 %vm94_vm1, %v1219_v22 }
 0x70f   :  { %1395 = vmatmul.mubr.msk.f32.gmra.mxu0 %vm94_vm1, %v1220_v23 }
 0x710   :  { %1397 = vmatprep.mubr.msk.f32.mxu0 %vm94_vm1, %v1221_v24 }
 0x713   :  { %1398 = vmatmul.mubr.msk.f32.gmra.mxu0 %vm94_vm1, %v1222_v25 }
 0x714   :  { %1416 = vmatprep.mubr.msk.f32.mxu0 %vm268_vm2, %v1239_v26 }
 0x7c7   :  { %v1390_v27 = vpop.f32.mrf.mxu0 }
 0x7c8   :  { %v740_v56 = vadd.f32 %v1390_v27, %v1224_v45 }
 0x7c9   :  { %v734_v28 = vpop.f32.mrf.mxu0 }
 0x7ca   :  { %v735_v59 = vadd.f32 %v1223_v52, %v734_v28  ;;  %v782_v60 = vmul.f32 0.70710677, %v740_v56  ;;  %v774_v23 = vmul.f32 0.5, %v740_v56  ;;  %v1247_v52 = vld [vmem:[%s1903_s6 + $0x20] sm:$0xff] }
 0x7cb   :  { %v1393_v29 = vpop.f32.mrf.mxu0 }
 0x7cc   :  { %v750_v43 = vadd.f32 %v1393_v29, %v1226_v35  ;;  %v781_v1 = vmul.f32 0.70710677, %v735_v59  ;;  %v773_v26 = vmul.f32 0.5, %v735_v59  ;;  %v1240_v29 = vld [vmem:[%s1902_s5 + $0x18] sm:$0xff] }
 0x7cd   :  { %v744_v30 = vpop.f32.mrf.mxu0 }
 0x7ce   :  { %v745_v48 = vadd.f32 %v1225_v39, %v744_v30  ;;  %v784_v57 = vmul.f32 0.70710677, %v750_v43  ;;  %v776_v16 = vmul.f32 0.5, %v750_v43  ;;  %v1242_v30 = vld [vmem:[%s1900_s3 + $0x98] sm:$0xff] }
 0x7cf   :  { %v1396_v32 = vpop.f32.mrf.mxu0 }
 0x7d0   :  { %v760_v34 = vadd.f32 %v1396_v32, %v1228_v31  ;;  %v783_v53 = vmul.f32 0.70710677, %v745_v48  ;;  %v775_v20 = vmul.f32 0.5, %v745_v48  ;;  %v1241_v32 = vld [vmem:[%s1900_s3 + $0x90] sm:$0xff]  ;;  %v1250_v48 = vld [vmem:[%s1903_s6 + $0x38] sm:$0xff]  ;;  %s1182_s3 = sshll.u32 %s1526_s25, 4  ;;  %s1183_s3 = int_to_ptr.vmem [resolvable:$true] %s1182_s3 }
 0x7d1   :  { %v754_v36 = vpop.f32.mrf.mxu0  ;;  %1419 = vmatprep.subr.mxu1 %v1250_v48  ;;  %s1504_s5 = scalar_lea.vmem %s1183_s3, 256  ;;  %p1509_p1 = scmp.lt.s32.totalorder %s1183_s3, %s1183_s3 }
 0x7d2   :  { %v755_v38 = vadd.f32 %v1227_v33, %v754_v36  ;;  %v786_v40 = vmul.f32 0.70710677, %v760_v34  ;;  %v778_v8 = vmul.f32 0.5, %v760_v34  ;;  %1420 = vmatpush3.msra.mxu1 %v1250_v48  ;;  %p1505_p0 = scmp.ne.s32.totalorder %s1183_s3, %s1504_s5  ;;  %p1510_p2 = scmp.lt.s32.totalorder %s1504_s5, %s1504_s5 }
 0x7d3   :  { %v1399_v41 = vpop.f32.mrf.mxu0 }
 0x7d4   :  { %v770_v44 = vadd.f32 %v1399_v41, %v1230_v37  ;;  %v785_v46 = vmul.f32 0.70710677, %v755_v38  ;;  %1476 = verf.f32 %v786_v40  ;;  %v777_v12 = vmul.f32 0.5, %v755_v38  ;;  %p1511_p3 = por %p1510_p2, %p1509_p1 }
 0x7d5   :  { %v764_v47 = vpop.f32.mrf.mxu0 }
 0x7d6   :  { %v788_v49 = vmul.f32 0.70710677, %v770_v44  ;;  %v765_v50 = vadd.f32 %v1229_v42, %v764_v47  ;;  %v780_v62 = vmul.f32 0.5, %v770_v44  ;;  %p1512_p4 = pnand %p1511_p3, %p1505_p0 }
 0x7d8   :  { %1478 = verf.f32 %v788_v49  ;;  %v787_v58 = vmul.f32 0.70710677, %v765_v50  ;;  %v779_v5 = vmul.f32 0.5, %v765_v50  ;;  %v1249_v49 = vld [vmem:[%s1903_s6 + $0x30] sm:$0xff]  ;;  %v1248_v50 = vld [vmem:[%s1903_s6 + $0x28] sm:$0xff] }
 0x7d9   :  { %1480 = verf.f32 %v785_v46  ;;  %1421 = vmatprep.subr.mxu1 %v1249_v49 }
 0x7da   :  { %1482 = verf.f32 %v787_v58  ;;  %1422 = vmatpush3.msra.mxu1 %v1249_v49  ;;  %v1261_v49 = vld [vmem:[%s1899_s2 + $0xc] ss:$0 sm:$0xff] }
 0x7db   :  { %1484 = verf.f32 %v784_v57  ;;  %1423 = vmatprep.subr.mxu1 %v1248_v50 }
 0x7dc   :  { %1486 = verf.f32 %v783_v53  ;;  %1424 = vmatpush3.msra.mxu1 %v1248_v50 }
 0x7dd   :  { %1488 = verf.f32 %v782_v60  ;;  %1425 = vmatprep.subr.mxu1 %v1247_v52 }
 0x7de   :  { %1490 = verf.f32 %v781_v1  ;;  %1426 = vmatpush3.msra.mxu1 %v1247_v52 }
 0x7e1   :  { %v1477_v61 = vpop.eup %1476 }
 0x7e2   :  { %v802_v6 = vadd.f32 1.0, %v1477_v61  ;;  %v1245_v61 = vld [vmem:[%s1899_s2 + $0x5] ss:$0 sm:$0xff] }
 0x7e4   :  { %v810_v13 = vmul.f32 %v802_v6, %v778_v8  ;;  %v1257_v6 = vld [vmem:[%s1904_s7 + $0x38] sm:$0xff]  ;;  %v1255_v8 = vld [vmem:[%s1904_s7 + $0x28] sm:$0xff] }
 0x7e5   :  { %v1479_v55 = vpop.eup %1478  ;;  %1430 = vmatprep.subr.mxu1 %v1257_v6 }
 0x7e6   :  { %v1481_v4 = vpop.eup %1480  ;;  %v804_v3 = vadd.f32 1.0, %v1479_v55 }
 0x7e7   :  { %v1483_v63 = vpop.eup %1482  ;;  %v801_v10 = vadd.f32 1.0, %v1481_v4 }
 0x7e8   :  { %v812_v0 = vmul.f32 %v804_v3, %v780_v62  ;;  %v803_v2 = vadd.f32 1.0, %v1483_v63  ;;  %v1485_v7 = vpop.eup %1484  ;;  %v1246_v63 = vld [vmem:[%s1899_s2 + $0x7] ss:$0 sm:$0xff] }
 0x7e9   :  { %v1487_v11 = vpop.eup %1486  ;;  %v800_v14 = vadd.f32 1.0, %v1485_v7  ;;  %v809_v17 = vmul.f32 %v801_v10, %v777_v12  ;;  %v1256_v7 = vld [vmem:[%s1904_s7 + $0x30] sm:$0xff]  ;;  %v1251_v10 = vld [vmem:[%s1899_s2 + $0x9] ss:$0 sm:$0xff] }
 0x7ea   :  { %1400 = vmatprep.subr.mxu0 %v812_v0  ;;  %v811_v9 = vmul.f32 %v803_v2, %v779_v5  ;;  %v1489_v15 = vpop.eup %1488  ;;  %v799_v18 = vadd.f32 1.0, %v1487_v11 }
 0x7eb   :  { %1401 = vmatpush3.msra.mxu0 %v812_v0  ;;  %v1491_v19 = vpop.eup %1490  ;;  %v808_v21 = vmul.f32 %v800_v14, %v776_v16  ;;  %v798_v22 = vadd.f32 1.0, %v1489_v15 }
 0x7ec   :  { %1402 = vmatprep.subr.mxu0 %v811_v9  ;;  %v807_v24 = vmul.f32 %v799_v18, %v775_v20  ;;  %v797_v25 = vadd.f32 1.0, %v1491_v19 }
 0x7ed   :  { %1403 = vmatpush3.msra.mxu0 %v811_v9  ;;  %v806_v27 = vmul.f32 %v798_v22, %v774_v23  ;;  %v1254_v9 = vld [vmem:[%s1904_s7 + $0x20] sm:$0xff] }
 0x7ee   :  { %1404 = vmatprep.subr.mxu0 %v810_v13  ;;  %v805_v28 = vmul.f32 %v797_v25, %v773_v26  ;;  %v1258_v25 = vld [vmem:[%s1899_s2 + $0xb] ss:$0 sm:$0xff] }
 0x7ef   :  { %1405 = vmatpush3.msra.mxu0 %v810_v13 }
 0x7f0   :  { %1406 = vmatprep.subr.mxu0 %v809_v17 }
 0x7f1   :  { %1407 = vmatpush3.msra.mxu0 %v809_v17 }
 0x7f2   :  { %1408 = vmatprep.subr.mxu0 %v808_v21 }
 0x7f3   :  { %1409 = vmatpush3.msra.mxu0 %v808_v21 }
 0x7f4   :  { %1410 = vmatprep.subr.mxu0 %v807_v24 }
 0x7f5   :  { %1411 = vmatpush3.msra.mxu0 %v807_v24 }
 0x7f6   :  { %1412 = vmatprep.subr.mxu0 %v806_v27 }
 0x7f7   :  { %1413 = vmatpush3.msra.mxu0 %v806_v27 }
 0x7f8   :  { %1414 = vmatprep.subr.mxu0 %v805_v28 }
 0x7f9   :  { %1415 = vmatpush3.msra.mxu0 %v805_v28 }
 0x7fa   :  { %1417 = vmatmul.mubr.msk.f32.vlgmr.msra.gmra.mxu0 %vm268_vm2, %v1240_v29 }
 0x8ba   :  { %v1418_v31 = vpop.f32.mrf.mxu0 }
 0x8bb   :  { %v896_v33 = vadd.f32 %v1418_v31, %v1242_v30 }
 0x8bc   :  { %v890_v34 = vpop.f32.mrf.mxu0 }
 0x8bd   :  { %v1827_v35 = vadd.f32 %v896_v33, %v1736_v51  ;;  %v891_v36 = vadd.f32 %v1241_v32, %v890_v34 }
 0x8bf   :  { %v1830_v37 = vadd.f32 %v891_v36, %v1740_v54  ;;  %v906_v38 = vsel %vm38_vm0, %v1827_v35, 0.0 }
 0x8c0   :  { %907 = vadd.xlane.f32.xlu1 %v906_v38 }
 0x8c1   :  { %v903_v39 = vsel %vm38_vm0, %v1830_v37, 0.0 }
 0x8c2   :  { %904 = vadd.xlane.f32.xlu0 %v903_v39 }
 0x949   :  { %v908_v40 = vpop.xlane.xlu1 %907 }
 0x94a   :  { %v910_v41 = vmul.f32 0.03125, %v908_v40 }
 0x94b   :  { %v905_v42 = vpop.xlane.xlu0 %904 }
 0x94c   :  { %v912_v43 = vsub.f32 %v1827_v35, %v910_v41  ;;  %v909_v44 = vmul.f32 0.03125, %v905_v42 }
 0x94e   :  { %v911_v51 = vsub.f32 %v1830_v37, %v909_v44  ;;  %v914_v45 = vmul.f32 %v912_v43, %v912_v43 }
 0x950   :  { %v918_v54 = vsel %vm38_vm0, %v914_v45, 0.0  ;;  %v913_v46 = vmul.f32 %v911_v51, %v911_v51 }
 0x951   :  { %919 = vadd.xlane.f32.xlu1 %v918_v54 }
 0x952   :  { %v915_v47 = vsel %vm38_vm0, %v913_v46, 0.0 }
 0x953   :  { %916 = vadd.xlane.f32.xlu0 %v915_v47 }
 0x9da   :  { %v920_v56 = vpop.xlane.xlu1 %919 }
 0x9db   :  { %v922_v57 = vmul.f32 0.03125, %v920_v56  ;;  %v1262_v56 = vld [vmem:[%s1899_s2 + $0xd] ss:$0 sm:$0xff] }
 0x9dc   :  { %v917_v58 = vpop.xlane.xlu0 %916 }
 0x9dd   :  { %v924_v59 = vadd.f32 1e-05, %v922_v57  ;;  %v921_v53 = vmul.f32 0.03125, %v917_v58 }
 0x9df   :  { %1492 = vrsqrt.f32 %v924_v59  ;;  %v923_v60 = vadd.f32 1e-05, %v921_v53 }
 0x9e1   :  { %1494 = vrsqrt.f32 %v923_v60 }
 0x9ec   :  { %v1493_v1 = vpop.eup %1492 }
 0x9ed   :  { %v928_v55 = vmul.f32 %v1493_v1, %v912_v43 }
 0x9ee   :  { %v1495_v4 = vpop.eup %1494 }
 0x9ef   :  { %v927_v62 = vmul.f32 %v1495_v4, %v911_v51  ;;  %v934_v3 = vmul.f32 %v1245_v61, %v928_v55 }
 0x9f1   :  { %v933_v5 = vmul.f32 %v1245_v61, %v927_v62  ;;  %v940_v2 = vadd.f32 %v1246_v63, %v934_v3 }
 0x9f3   :  { %v939_v0 = vadd.f32 %v1246_v63, %v933_v5 }
 0x9f5   :  { %1427 = vmatprep.mubr.msk.f32.mxu1 %vm38_vm0, %v939_v0 }
 0x9f6   :  { %1428 = vmatmul.mubr.msk.f32.vlgmr.msra.gmra.mxu1 %vm38_vm0, %v940_v2 }
 0x9f7   :  { %1431 = vmatpush3.msra.mxu1 %v1257_v6 }
 0x9f8   :  { %1432 = vmatprep.subr.mxu1 %v1256_v7 }
 0x9f9   :  { %1433 = vmatpush3.msra.mxu1 %v1256_v7 }
 0x9fa   :  { %1434 = vmatprep.subr.mxu1 %v1255_v8 }
 0x9fb   :  { %1435 = vmatpush3.msra.mxu1 %v1255_v8 }
 0x9fc   :  { %1436 = vmatprep.subr.mxu1 %v1254_v9 }
 0x9fd   :  { %1437 = vmatpush3.msra.mxu1 %v1254_v9 }
 0xab6   :  { %v1429_v11 = vpop.f32.mrf.mxu1 }
 0xab7   :  { %v1029_v12 = vadd.f32 %v1429_v11, %v1251_v10 }
 0xab8   :  { %v1023_v13 = vpop.f32.mrf.mxu1 }
 0xab9   :  { %v1035_v14 = vmul.f32 0.70710677, %v1029_v12  ;;  %v1024_v15 = vadd.f32 %v1251_v10, %v1023_v13  ;;  %v1033_v22 = vmul.f32 0.5, %v1029_v12 }
 0xabb   :  { %1496 = verf.f32 %v1035_v14  ;;  %v1034_v16 = vmul.f32 0.70710677, %v1024_v15  ;;  %v1032_v20 = vmul.f32 0.5, %v1024_v15 }
 0xabd   :  { %1498 = verf.f32 %v1034_v16 }
 0xac8   :  { %v1497_v17 = vpop.eup %1496 }
 0xac9   :  { %v1039_v19 = vadd.f32 1.0, %v1497_v17 }
 0xaca   :  { %v1499_v18 = vpop.eup %1498 }
 0xacb   :  { %v1038_v21 = vadd.f32 1.0, %v1499_v18  ;;  %v1041_v24 = vmul.f32 %v1039_v19, %v1033_v22 }
 0xacd   :  { %v1040_v23 = vmul.f32 %v1038_v21, %v1032_v20 }
 0xacf   :  { %1438 = vmatprep.mubr.msk.f32.mxu1 %vm38_vm0, %v1040_v23 }
 0xad0   :  { %1439 = vmatmul.mubr.msk.f32.vlgmr.msra.gmra.mxu1 %vm38_vm0, %v1041_v24 }
 0xb90   :  { %v1440_v26 = vpop.f32.mrf.mxu1 }
 0xb91   :  { %v1130_v27 = vadd.f32 %v1440_v26, %v1258_v25 }
 0xb92   :  { %v1124_v28 = vpop.f32.mrf.mxu1 }
 0xb93   :  { %v1125_v29 = vadd.f32 %v1258_v25, %v1124_v28  ;;  %v1134_v30 = vadd.f32 %v1130_v27, %v1827_v35 }
 0xb95   :  { %v1140_v31 = vsel %vm38_vm0, %v1134_v30, 0.0  ;;  %v1133_v32 = vadd.f32 %v1125_v29, %v1830_v37 }
 0xb96   :  { %1141 = vadd.xlane.f32.xlu1 %v1140_v31 }
 0xb97   :  { %v1137_v33 = vsel %vm38_vm0, %v1133_v32, 0.0 }
 0xb98   :  { %1138 = vadd.xlane.f32.xlu0 %v1137_v33 }
 0xc1f   :  { %v1142_v34 = vpop.xlane.xlu1 %1141 }
 0xc20   :  { %v1144_v36 = vmul.f32 0.03125, %v1142_v34 }
 0xc21   :  { %v1139_v38 = vpop.xlane.xlu0 %1138 }
 0xc22   :  { %v1146_v39 = vsub.f32 %v1134_v30, %v1144_v36  ;;  %v1143_v40 = vmul.f32 0.03125, %v1139_v38 }
 0xc24   :  { %v1145_v41 = vsub.f32 %v1133_v32, %v1143_v40  ;;  %v1148_v42 = vmul.f32 %v1146_v39, %v1146_v39 }
 0xc26   :  { %v1152_v43 = vsel %vm38_vm0, %v1148_v42, 0.0  ;;  %v1147_v44 = vmul.f32 %v1145_v41, %v1145_v41 }
 0xc27   :  { %1153 = vadd.xlane.f32.xlu1 %v1152_v43 }
 0xc28   :  { %v1149_v35 = vsel %vm38_vm0, %v1147_v44, 0.0 }
 0xc29   :  { %1150 = vadd.xlane.f32.xlu0 %v1149_v35 }
 0xcb0   :  { %v1154_v51 = vpop.xlane.xlu1 %1153 }
 0xcb1   :  { %v1156_v37 = vmul.f32 0.03125, %v1154_v51 }
 0xcb2   :  { %v1151_v45 = vpop.xlane.xlu0 %1150 }
 0xcb3   :  { %v1158_v54 = vadd.f32 1e-05, %v1156_v37  ;;  %v1155_v46 = vmul.f32 0.03125, %v1151_v45 }
 0xcb5   :  { %1500 = vrsqrt.f32 %v1158_v54  ;;  %v1157_v47 = vadd.f32 1e-05, %v1155_v46 }
 0xcb7   :  { %1502 = vrsqrt.f32 %v1157_v47 }
 0xcc2   :  { %v1501_v48 = vpop.eup %1500 }
 0xcc3   :  { %v1162_v50 = vmul.f32 %v1501_v48, %v1146_v39 }
 0xcc4   :  { %v1503_v52 = vpop.eup %1502 }
 0xcc5   :  { %v1161_v57 = vmul.f32 %v1503_v52, %v1145_v41  ;;  %v1168_v58 = vmul.f32 %v1261_v49, %v1162_v50 }
 0xcc7   :  { %v1167_v59 = vmul.f32 %v1261_v49, %v1161_v57  ;;  %v1174_v53 = vadd.f32 %v1262_v56, %v1168_v58 }
 0xcc9   :  { %v1173_v60 = vadd.f32 %v1262_v56, %v1167_v59  ;;  %1176 = vst.msk [vmem:[#allocation2 + $0x8] sm:$0xff] %vm38_vm0, %v1174_v53 }
 0xccb   :  { %1175 = vst.msk [vmem:[#allocation2] sm:$0xff] %vm38_vm0, %v1173_v60 }
 0xccc   :  { %1515 = shalt.err (!%p1512_p4)
}
 0xccd   :  { %s1527_s2 = smov 128   ;;  %s1528_s26 = smov 8  }
 0xcce   :  { %1188 = dma.vmem_to_hbm [thread:$0]  %s1183_s3, 256, %s1905_s8, [#allocation3], %s1527_s2, %s1527_s2, %s1528_s26  }
 0xccf   :  { %1524 = dma.done.wait [#allocation3], 256  }
 0xcd0   :  { %1525 = vsyncadd [#allocation3], 4294967040 }
 0xcd1   :  { %1192 = vsyncpa [#allocation3], 1 }

</bundles_post_ra>
